<compile_context>
chip_gen: v6e
topology: v6e:2x2x1
jax: 0.10.0
libtpu: 0.0.40
codegen_flags: <defaults>
</compile_context>

<pallas_src>
import functools
import math

import jax
import jax.numpy as jnp
from jax.experimental import pallas as pl
from jax.experimental.pallas import tpu as pltpu


_PAD_X = 1e4   # pad logit: sigmoid(1e4) == 1 up to f32 => zero loss with label 1
_PAD_Y = 1.0   # pad label


def _wasym_loss_kernel(x_ref, y_ref, out_ref, *, log_eps):
    j = pl.program_id(1)  # class-tile (reduction) axis, innermost

    @pl.when(j == 0)
    def _zero():
        out_ref[...] = jnp.zeros_like(out_ref)

    x = x_ref[...].astype(jnp.float32)   # (tile_b//G, G, tile_c)
    y = y_ref[...].astype(jnp.float32)

    # Numerically stable log(sigmoid(x)): one exp + one log on the EUP.
    log_p = jnp.minimum(x, 0.0) - jnp.log(1.0 + jnp.exp(-jnp.abs(x)))
    # log(1 - sigmoid(x)) = log(sigmoid(-x)) = log(sigmoid(x)) - x
    log_1mp = log_p - x

    # clamp(p, min=eps) before the log  <=>  max(log(.), log(eps)) after.
    a = jnp.maximum(log_p, log_eps)      # y-branch
    b = jnp.maximum(log_1mp, log_eps)    # (1-y)-branch
    # y*a + (1-y)*b == b + y*(a - b): one fewer mul, no (1-y) materialization.
    contrib = b + y * (a - b)

    # VPU-only partial reduction over the leading (non-tiled) axis: pure vreg
    # adds into the resident, lane/sublane-dense output block.
    out_ref[...] += contrib.sum(axis=0, keepdims=True)


def _round_up(v, m):
    return (v + m - 1) // m * m


def _sublane_group(dtype):
    # f32 -> 8 sublanes, bf16/f16 -> 16, int8/fp8 -> 32
    return {4: 8, 2: 16, 1: 32}.get(jnp.dtype(dtype).itemsize, 8)


def _physical_vmem_bytes():
    try:
        info = pltpu.get_tpu_info()
        v = int(getattr(info, "vmem_capacity_bytes", 0) or 0)
        if v > 0:
            return v
    except Exception:
        pass
    return 64 * 1024 * 1024  # conservative default (v7x per-TensorCore VMEM)


def _choose_tiling(bs, nc, x_dtype, y_dtype, max_tile_b, max_tile_c):
    group = max(_sublane_group(x_dtype), _sublane_group(y_dtype), 8)

    # ---- class (lane) axis: pad to 128 and split into <= max_tile_c tiles ----
    nc128 = _round_up(nc, 128)
    n_ct = max(1, pl.cdiv(nc128, max_tile_c))
    tile_c = _round_up(pl.cdiv(nc128, n_ct), 128)
    nc_pad = n_ct * tile_c

    # ---- VMEM budget (generation-aware) -> batch rows per grid step ---------
    phys = _physical_vmem_bytes()
    budget = phys * 2 // 5                                   # ~40% for tiling math
    vmem_limit = min(phys * 3 // 4, 112 * 1024 * 1024)       # scoped limit w/ headroom
    x_item = jnp.dtype(x_dtype).itemsize
    y_item = jnp.dtype(y_dtype).itemsize
    per_row = (2 * tile_c * (x_item + y_item)   # 2 inputs, double-buffered
               + 4 * tile_c * 4)                # ~4 live f32 intermediates
    target_b = max(group, min(max_tile_b, budget // per_row))

    # ---- batch (sublane) axis: >= 2 even tiles when possible (megacore) -----
    bs_a = _round_up(bs, group)
    n_bt = max(1, pl.cdiv(bs_a, target_b))
    if n_bt == 1 and bs_a >= 2 * group:
        n_bt = 2
    if n_bt > 1 and n_bt % 2:
        n_bt += 1
    tile_b = _round_up(pl.cdiv(bs_a, n_bt), group)
    bs_pad = n_bt * tile_b

    return group, tile_b, tile_c, n_bt, n_ct, bs_pad, nc_pad, int(vmem_limit)


def weighted_asymmetric_loss(x, y, eps=1e-8, weight=None, *,
                             max_tile_b=512, max_tile_c=2048):
    """Pallas implementation of WeightedAsymmetricLoss.forward.

    x, y: (batch, num_classes). f32 / bf16 / int8 inputs accepted (compute is
    always f32). Returns {'loss': ...} matching the PyTorch module (scalar loss
    if weight is None, else (1, num_classes) after broadcasting).
    """
    bs, nc = x.shape
    assert y.shape == (bs, nc)

    (group, tile_b, tile_c, n_bt, n_ct,
     bs_pad, nc_pad, vmem_limit) = _choose_tiling(
        bs, nc, x.dtype, y.dtype, max_tile_b, max_tile_c)

    # Pad with values whose loss contribution is exactly zero, then view as
    # (rows/G, G, classes) so per-step reduction is layout-native.
    if bs_pad != bs or nc_pad != nc:
        pad_cfg = ((0, bs_pad - bs), (0, nc_pad - nc))
        x = jnp.pad(x, pad_cfg, constant_values=_PAD_X)
        y = jnp.pad(y, pad_cfg, constant_values=_PAD_Y)
    x3 = jnp.reshape(x, (bs_pad // group, group, nc_pad))
    y3 = jnp.reshape(y, (bs_pad // group, group, nc_pad))

    kernel = functools.partial(_wasym_loss_kernel, log_eps=float(math.log(eps)))

    cost = pl.CostEstimate(
        flops=12 * bs_pad * nc_pad,
        transcendentals=2 * bs_pad * nc_pad,
        bytes_accessed=(bs_pad * nc_pad * (jnp.dtype(x.dtype).itemsize
                                           + jnp.dtype(y.dtype).itemsize)
                        + n_bt * group * tile_c * 4),
    )

    partials = pl.pallas_call(
        kernel,
        out_shape=jax.ShapeDtypeStruct((n_bt, group, tile_c), jnp.float32),
        grid=(n_bt, n_ct),
        in_specs=[
            pl.BlockSpec((tile_b // group, group, tile_c), lambda i, j: (i, 0, j)),
            pl.BlockSpec((tile_b // group, group, tile_c), lambda i, j: (i, 0, j)),
        ],
        # One lane-dense partial block per batch tile; same block across the
        # class (reduction) axis so it stays resident until the last step.
        out_specs=pl.BlockSpec((1, group, tile_c), lambda i, j: (i, 0, 0)),
        compiler_params=pltpu.CompilerParams(
            dimension_semantics=("parallel", "arbitrary"),
            vmem_limit_bytes=vmem_limit,
        ),
        cost_estimate=cost,
    )(x3, y3)

    total = jnp.sum(partials, dtype=jnp.float32)
    loss = -total / jnp.float32(bs)
    if weight is not None:
        # Matches PyTorch: scalar loss * weight.view(1, -1) -> (1, num_classes).
        loss = loss * jnp.reshape(weight, (1, -1)).astype(loss.dtype)
    return {"loss": loss}


def _reference(x, y, eps=1e-8, weight=None):
    # Literal transcription of the PyTorch forward, for validation.
    p = jax.nn.sigmoid(x.astype(jnp.float32))
    yf = y.astype(jnp.float32)
    los_pos = yf * jnp.log(jnp.maximum(p, eps))
    los_neg = (1.0 - yf) * jnp.log(jnp.maximum(1.0 - p, eps))
    loss = -jnp.sum(los_pos + los_neg) / x.shape[0]
    if weight is not None:
        loss = loss * jnp.reshape(weight, (1, -1))
    return loss


if __name__ == "__main__":
    key = jax.random.PRNGKey(0)
    kx, ky, kw = jax.random.split(key, 3)

    # Small shape consistent with the multi-label head (exercises padding).
    batch, num_classes = 2, 16
    x = jax.random.normal(kx, (batch, num_classes), dtype=jnp.float32)
    y = (jax.random.uniform(ky, (batch, num_classes)) > 0.5).astype(jnp.float32)

    out = weighted_asymmetric_loss(x, y)
    loss = jax.block_until_ready(out["loss"])
    ref = _reference(x, y)
    assert jnp.allclose(loss, ref, rtol=1e-5, atol=1e-5), (loss, ref)

    # Weighted path: scalar loss * weight.view(1, -1) -> (1, num_classes)
    w = jax.random.uniform(kw, (num_classes,), dtype=jnp.float32)
    outw = weighted_asymmetric_loss(x, y, weight=w)
    lossw = jax.block_until_ready(outw["loss"])
    refw = _reference(x, y, weight=w)
    assert lossw.shape == (1, num_classes)
    assert jnp.allclose(lossw, refw, rtol=1e-5, atol=1e-5), (lossw, refw)

    # Unaligned, multi-tile shape: padding + multi-step class reduction +
    # multiple batch tiles (small tiles forced for testing).
    b2, c2 = 48, 300
    x2 = jax.random.normal(kx, (b2, c2), dtype=jnp.float32)
    y2 = (jax.random.uniform(ky, (b2, c2)) > 0.5).astype(jnp.float32)
    out2 = weighted_asymmetric_loss(x2, y2, max_tile_b=16, max_tile_c=128)
    loss2 = jax.block_until_ready(out2["loss"])
    ref2 = _reference(x2, y2)
    assert jnp.allclose(loss2, ref2, rtol=2e-5, atol=1e-3), (loss2, ref2)

    # bf16 inputs (halves HBM traffic; compute stays f32; group becomes 16).
    x3 = x2.astype(jnp.bfloat16)
    y3 = y2.astype(jnp.bfloat16)
    out3 = weighted_asymmetric_loss(x3, y3)
    loss3 = jax.block_until_ready(out3["loss"])
    ref3 = _reference(x3.astype(jnp.float32), y3.astype(jnp.float32))
    assert jnp.allclose(loss3, ref3, rtol=5e-3, atol=5e-2), (loss3, ref3)

    print("KERNEL_OK")
</pallas_src>

<mosaic_0001>
module attributes {stable_mosaic.version = 11 : i64} {
  func.func @_wasym_loss_kernel(%arg0: i32, %arg1: i32, %arg2: memref<1x8x128xf32, #tpu.memory_space<vmem>>, %arg3: memref<1x8x128xf32, #tpu.memory_space<vmem>>, %arg4: memref<1x8x128xf32, #tpu.memory_space<vmem>>) attributes {dimension_semantics = [#tpu.dimension_semantics<parallel>, #tpu.dimension_semantics<arbitrary>], iteration_bounds = array<i64: 1, 1>, scalar_prefetch = 0 : i64, scratch_operands = 0 : i64, tpu.core_type = #tpu.core_type<tc>, window_params = [{transform_indices = @transform_0, window_bounds = array<i64: 1, 8, 128>}, {transform_indices = @transform_1, window_bounds = array<i64: 1, 8, 128>}, {transform_indices = @transform_2, window_bounds = array<i64: 1, 8, 128>}]} {
    %c0_i32 = arith.constant 0 : i32
    %0 = arith.cmpi eq, %arg1, %c0_i32 : i32
    %1 = arith.extui %0 : i1 to i32
    %c0_i32_0 = arith.constant 0 : i32
    %2 = arith.cmpi ne, %1, %c0_i32_0 : i32
    scf.if %2 {
      %cst_17 = arith.constant 0.000000e+00 : f32
      %28 = vector.broadcast %cst_17 : f32 to vector<1x8x128xf32>
      %c0_18 = arith.constant 0 : index
      %c0_19 = arith.constant 0 : index
      %c0_20 = arith.constant 0 : index
      %29 = vector.load %arg4[%c0_18, %c0_19, %c0_20] : memref<1x8x128xf32, #tpu.memory_space<vmem>>, vector<1x8x128xf32>
      tpu.vector_store %arg4[%c0_18, %c0_19, %c0_20], %28 {strides = array<i32>} : memref<1x8x128xf32, #tpu.memory_space<vmem>>, vector<1x8x128xf32>,
    } else {
    }
    %c0 = arith.constant 0 : index
    %c0_1 = arith.constant 0 : index
    %c0_2 = arith.constant 0 : index
    %3 = vector.load %arg2[%c0, %c0_1, %c0_2] : memref<1x8x128xf32, #tpu.memory_space<vmem>>, vector<1x8x128xf32>
    %c0_3 = arith.constant 0 : index
    %c0_4 = arith.constant 0 : index
    %c0_5 = arith.constant 0 : index
    %4 = vector.load %arg3[%c0_3, %c0_4, %c0_5] : memref<1x8x128xf32, #tpu.memory_space<vmem>>, vector<1x8x128xf32>
    %cst = arith.constant 0.000000e+00 : f32
    %5 = vector.broadcast %cst : f32 to vector<1x8x128xf32>
    %6 = arith.minimumf %3, %5 : vector<1x8x128xf32>
    %7 = math.absf %3 : vector<1x8x128xf32>
    %cst_6 = arith.constant 0.000000e+00 : f32
    %8 = vector.broadcast %cst_6 : f32 to vector<1x8x128xf32>
    %9 = arith.subf %8, %7 : vector<1x8x128xf32>
    %10 = math.exp %9 : vector<1x8x128xf32>
    %cst_7 = arith.constant 1.000000e+00 : f32
    %11 = vector.broadcast %cst_7 : f32 to vector<1x8x128xf32>
    %12 = arith.addf %11, %10 : vector<1x8x128xf32>
    %13 = math.log %12 : vector<1x8x128xf32>
    %14 = arith.subf %6, %13 : vector<1x8x128xf32>
    %15 = arith.subf %14, %3 : vector<1x8x128xf32>
    %cst_8 = arith.constant -18.420681 : f32
    %16 = vector.broadcast %cst_8 : f32 to vector<1x8x128xf32>
    %17 = arith.maximumf %14, %16 : vector<1x8x128xf32>
    %cst_9 = arith.constant -18.420681 : f32
    %18 = vector.broadcast %cst_9 : f32 to vector<1x8x128xf32>
    %19 = arith.maximumf %15, %18 : vector<1x8x128xf32>
    %20 = arith.subf %17, %19 : vector<1x8x128xf32>
    %21 = arith.mulf %4, %20 : vector<1x8x128xf32>
    %22 = arith.addf %19, %21 : vector<1x8x128xf32>
    %c0_10 = arith.constant 0 : index
    %c0_11 = arith.constant 0 : index
    %c0_12 = arith.constant 0 : index
    %23 = vector.load %arg4[%c0_10, %c0_11, %c0_12] : memref<1x8x128xf32, #tpu.memory_space<vmem>>, vector<1x8x128xf32>
    %cst_13 = arith.constant dense<0.000000e+00> : vector<8x128xf32>
    %24 = vector.multi_reduction <add>, %22, %cst_13 [0] : vector<1x8x128xf32> to vector<8x128xf32>
    %25 = vector.shape_cast %24 : vector<8x128xf32> to vector<1x8x128xf32>
    %26 = arith.addf %23, %25 : vector<1x8x128xf32>
    %c0_14 = arith.constant 0 : index
    %c0_15 = arith.constant 0 : index
    %c0_16 = arith.constant 0 : index
    %27 = vector.load %arg4[%c0_14, %c0_15, %c0_16] : memref<1x8x128xf32, #tpu.memory_space<vmem>>, vector<1x8x128xf32>
    tpu.vector_store %arg4[%c0_14, %c0_15, %c0_16], %26 {strides = array<i32>} : memref<1x8x128xf32, #tpu.memory_space<vmem>>, vector<1x8x128xf32>,
    return
  }
  func.func @transform_0(%arg0: i32, %arg1: i32) -> (i32, i32, i32) {
    %c0_i32 = arith.constant 0 : i32
    %c0_i32_0 = arith.constant 0 : i32
    return %arg0, %c0_i32, %arg1 : i32, i32, i32
  }
  func.func @transform_1(%arg0: i32, %arg1: i32) -> (i32, i32, i32) {
    %c0_i32 = arith.constant 0 : i32
    %c0_i32_0 = arith.constant 0 : i32
    return %arg0, %c0_i32, %arg1 : i32, i32, i32
  }
  func.func @transform_2(%arg0: i32, %arg1: i32) -> (i32, i32, i32) {
    %c0_i32 = arith.constant 0 : i32
    %c0_i32_0 = arith.constant 0 : i32
    %c0_i32_1 = arith.constant 0 : i32
    return %arg0, %c0_i32, %c0_i32_0 : i32, i32, i32
  }
}

</mosaic_0001>

<bundles_post_ra>
// kernel: tpu_custom_call.1
= control target key start
LH: loop header
LB: loop body
LE: loop exit
PB: predicated region body
PF: predicated region fallthrough
CT: control target
= control target key end

     0   :  { %7 = vsyncpa [#allocation3], 0  ;;  %s179_s0 = inlined_call_operand.hbm [shape: f32[1,8,128], index: 0, kind: input, shape index: {}]   ;;  %s180_s1 = inlined_call_operand.hbm [shape: f32[1,8,128], index: 1, kind: input, shape index: {}]   ;;  %s181_s2 = inlined_call_operand.hbm [shape: f32[1,8,128], index: 2, kind: output, shape index: {}]  }
   0x1   :  { %8 = vsyncpa [#allocation6], 0 }
   0x2   :  { %9 = vsyncpa [#allocation4], 0  ;;  %s152_s9 = smov [#allocation2]   ;;  %s153_s11 = smov [#allocation5]  }
   0x3   :  { %s16_s10 = sshll.u32 %s152_s9, 4  ;;  %s26_s12 = sshll.u32 %s153_s11, 4  ;;  %s17_s10 = int_to_ptr.vmem [resolvable:$true] %s16_s10  ;;  %s27_s12 = int_to_ptr.vmem [resolvable:$true] %s26_s12 }
   0x4   :  { %s94_s13 = scalar_lea.vmem %s17_s10, 128  ;;  %p99_p1 = scmp.lt.s32.totalorder %s17_s10, %s17_s10 }
   0x5   :  { %p95_p0 = scmp.ne.s32.totalorder %s17_s10, %s94_s13  ;;  %p100_p2 = scmp.lt.s32.totalorder %s94_s13, %s94_s13 }
   0x7   :  { %p101_p3 = por %p100_p2, %p99_p1 }
   0x9   :  { %p102_p4 = pnand %p101_p3, %p95_p0 }
   0xb   :  { %105 = shalt.err (!%p102_p4)
}
   0xc   :  { %19 = dma.hbm_to_vmem [thread:$0]  %s179_s0, 128, %s17_s10, [#allocation3]  }
   0xd   :  { %s114_s16 = scalar_lea.vmem %s27_s12, 128  ;;  %p119_p6 = scmp.lt.s32.totalorder %s27_s12, %s27_s12 }
   0xe   :  { %p115_p5 = scmp.ne.s32.totalorder %s27_s12, %s114_s16  ;;  %p120_p7 = scmp.lt.s32.totalorder %s114_s16, %s114_s16 }
  0x10   :  { %p121_p8 = por %p120_p7, %p119_p6 }
  0x12   :  { %p122_p9 = pnand %p121_p8, %p115_p5 }
  0x14   :  { %125 = shalt.err (!%p122_p9)
}
  0x15   :  { %29 = dma.hbm_to_vmem [thread:$0]  %s180_s1, 128, %s27_s12, [#allocation6]  }
  0x16   :  { %146 = dma.done.wait [#allocation3], 128  }
  0x17   :  { %147 = vsyncadd [#allocation3], 4294967168 }
  0x18   :  { %148 = dma.done.wait [#allocation6], 128  }
  0x19   :  { %149 = vsyncadd [#allocation6], 4294967168  ;;  %v41_v0 = vld [vmem:[#allocation2] sm:$0xff]  ;;  %v42_v13 = vld [vmem:[#allocation5] sm:$0xff]  ;;  %s154_s0 = smov [#allocation7]  }
  0x1a   :  { %v44_v1 = vand.u32 2147483647, %v41_v0  ;;  %v43_v6 = vmin.f32 %v41_v0, 0.0  ;;  %s68_s1 = sshll.u32 %s154_s0, 4  ;;  %s69_s1 = int_to_ptr.vmem [resolvable:$true] %s68_s1 }
  0x1b   :  { %s126_s19 = scalar_lea.vmem %s69_s1, 128  ;;  %p131_p11 = scmp.lt.s32.totalorder %s69_s1, %s69_s1 }
  0x1c   :  { %v45_v2 = vsub.f32 0.0, %v44_v1  ;;  %p127_p10 = scmp.ne.s32.totalorder %s69_s1, %s126_s19  ;;  %p132_p12 = scmp.lt.s32.totalorder %s126_s19, %s126_s19 }
  0x1e   :  { %v46_v3 = vmul.f32 1.442695, %v45_v2  ;;  %p133_p13 = por %p132_p12, %p131_p11 }
  0x20   :  { %82 = vpow2.f32 %v46_v3  ;;  %p134_p0 = pnand %p133_p13, %p127_p10 }
  0x2d   :  { %v83_v4 = vpop.eup %82 }
  0x2e   :  { %v48_v5 = vadd.f32 1.0, %v83_v4 }
  0x30   :  { %84 = vlog2.f32 %v48_v5 }
  0x3d   :  { %v85_v7 = vpop.eup %84 }
  0x3e   :  { %v50_v8 = vmul.f32 0.6931472, %v85_v7 }
  0x40   :  { %v51_v9 = vsub.f32 %v43_v6, %v50_v8 }
  0x42   :  { %v52_v10 = vsub.f32 %v51_v9, %v41_v0  ;;  %v53_v11 = vmax.f32 %v51_v9, -18.420681 }
  0x44   :  { %v54_v12 = vmax.f32 %v52_v10, -18.420681 }
  0x46   :  { %v55_v14 = vsub.f32 %v53_v11, %v54_v12 }
  0x48   :  { %v56_v15 = vmul.f32 %v55_v14, %v42_v13 }
  0x4a   :  { %v57_v16 = vadd.f32 %v56_v15, %v54_v12 }
  0x4c   :  { %61 = vst [vmem:[#allocation7] sm:$0xff] %v57_v16 }
  0x4d   :  { %137 = shalt.err (!%p134_p0)
}
  0x4e   :  { %71 = dma.vmem_to_hbm [thread:$0]  %s69_s1, 128, %s181_s2, [#allocation4]  }
  0x4f   :  { %150 = dma.done.wait [#allocation4], 128  }
  0x50   :  { %151 = vsyncadd [#allocation4], 4294967168 }
  0x51   :  { %75 = vsyncpa [#allocation3], 1 }
  0x52   :  { %76 = vsyncpa [#allocation6], 1 }
  0x53   :  { %77 = vsyncpa [#allocation4], 1 }

</bundles_post_ra>
